<compile_context>
chip_gen: v7x
topology: tpu7x:2x2x1
jax: 0.10.0
libtpu: 0.0.40
codegen_flags: <defaults>
</compile_context>

<pallas_src>
import jax
import jax.numpy as jnp
from jax.experimental import pallas as pl
from jax.experimental.pallas import tpu as pltpu


_LANE = 128                    # vreg lane width (last dim)
_MIN_GRID_STEPS = 4            # want >= this many steps for software pipelining
_MIN_TILE_BYTES = 512 * 1024   # don't shrink tiles below this chasing grid length


def _round_up(x: int, m: int) -> int:
    return -(-x // m) * m


def _cdiv(x: int, m: int) -> int:
    return -(-x // m)


def _sublanes(dtype) -> int:
    # Rows per packed (sublane, lane) tile: 8 for f32, 16 for bf16, 32 for int8/fp8.
    return max(8, 32 // jnp.dtype(dtype).itemsize)


def _tile_target_bytes() -> int:
    """Per-buffer tile target.  The double-buffered in+out working set is ~4x
    this (+ a pe tile), which must stay under the scoped-VMEM defaults
    (16 MiB v5e, 32 MiB v6e/v7x)."""
    try:
        vmem = pltpu.get_tpu_info().vmem_capacity_bytes
    except Exception:          # not on TPU / query unavailable -> safe default
        return 2 << 20
    if vmem <= (64 << 20):     # v7x-class: 64 MiB physical VMEM, 3.2 TB/s HBM
        return 4 << 20
    return 2 << 20             # v5e/v6e: stay under v5e's 16 MiB scoped default


# --------------------------------------------------------------------------
# Parameter setup (plain JAX): replicates PositionalEncoding.__init__ exactly.
# NOTE: the reference module uses max_len as the frequency base:
#       den = 1 / max_len ** (2*i / d_model)   (NOT 10000).
# --------------------------------------------------------------------------
def build_positional_encoding(d_model: int, max_len: int = 500,
                              dtype=jnp.float32) -> jnp.ndarray:
    pos = jnp.arange(0, max_len, dtype=jnp.float32)[:, None]            # (max_len, 1)
    tmp = jnp.arange(0, d_model, 2, dtype=jnp.float32)                  # (d_model//2,)
    den = 1.0 / jnp.power(
        jnp.full((d_model // 2,), float(max_len), dtype=jnp.float32),
        2.0 * tmp / float(d_model))                                     # (d_model//2,)
    angles = pos * den[None, :]                                         # (max_len, d/2)
    pe = jnp.stack([jnp.sin(angles), jnp.cos(angles)], axis=-1)         # even=sin, odd=cos
    pe = pe.reshape(max_len, d_model)
    # Cache pe in the model dtype at build time (avoids per-call convert).
    return pe.astype(dtype)


# --------------------------------------------------------------------------
# Kernel (one body covers every path; the binding resource is HBM DMA, so no
# compute-side tricks are needed — one VPU add + one store per vreg).
# --------------------------------------------------------------------------
def _pe_add_kernel(x_ref, pe_ref, o_ref):
    # pe_ref either matches x_ref's block shape exactly, or is a (1, tc) row
    # that sublane-broadcasts over the batch rows.
    o_ref[...] = x_ref[...] + pe_ref[...]


# --------------------------------------------------------------------------
# Paths
# --------------------------------------------------------------------------
def _forward_seq_tiled(x, pe_s, itemsize, sub, target, io_aliases, cost):
    """(ts, D) blocks per batch element (batch dim squeezed).  Grid is
    (seq_blocks, B) with B innermost, so the pe block index is unchanged across
    consecutive steps and Pallas does not re-stream pe per batch element."""
    B, S, D = x.shape
    d_pad = _round_up(D, _LANE)                       # VMEM pads lanes to 128
    ts_cap = max(sub, (target // (d_pad * itemsize)) // sub * sub)
    ts = min(_round_up(S, sub), ts_cap)

    # Ensure a few grid steps for DMA/compute overlap (tiles >= 512 KiB;
    # tiny inputs simply don't pipeline, which is fine).
    if _cdiv(S, ts) * B < _MIN_GRID_STEPS:
        want_s = _cdiv(_MIN_GRID_STEPS, B)
        ts_for_steps = _round_up(max(sub, _cdiv(S, want_s)), sub)
        ts_floor = max(sub, (_MIN_TILE_BYTES // (d_pad * itemsize)) // sub * sub)
        new_ts = max(ts_floor, ts_for_steps)
        if new_ts < ts:
            ts = new_ts
    if ts >= S:
        ts = S                                        # full-dim block, no masked tail
    s_steps = _cdiv(S, ts)

    return pl.pallas_call(
        _pe_add_kernel,
        out_shape=jax.ShapeDtypeStruct((B, S, D), x.dtype),
        grid=(s_steps, B),
        in_specs=[
            pl.BlockSpec((None, ts, D), lambda s, b: (b, s, 0)),
            pl.BlockSpec((ts, D), lambda s, b: (s, 0)),
        ],
        out_specs=pl.BlockSpec((None, ts, D), lambda s, b: (b, s, 0)),
        compiler_params=pltpu.CompilerParams(
            dimension_semantics=("parallel", "parallel")),
        cost_estimate=cost,
        input_output_aliases=io_aliases,
    )(x, pe_s)


def _forward_flat(x, pe_s, itemsize, sub, target, io_aliases, cost):
    """Lane-dense path: each batch element viewed as a flat row of S*D values
    (a multiple of 128) -> full-width unmasked stores; columns (and, for large
    B, rows) are tiled for deep pipelining.  pe is read from HBM ~once."""
    B, S, D = x.shape
    E = S * D
    pe_flat = pe_s.reshape(1, E)

    if B == 1 and E % (sub * _LANE) == 0:
        # Fold the single batch row into `sub` dense sublane rows; pe folds
        # identically, so this is a plain same-shape elementwise add.
        rows, cols = sub, E // sub
        x2 = x.reshape(rows, cols)
        pe2 = pe_flat.reshape(rows, cols)
        pe_is_row = False
    else:
        rows, cols = B, E
        x2 = x.reshape(rows, cols)
        pe2 = pe_flat                  # (1, E): sublane-broadcast over batch rows
        pe_is_row = True

    # Joint row/column tile selection, sized against the *padded* sublane count.
    tc0 = min(_round_up(cols, _LANE),
              max(_LANE, (target // (sub * itemsize)) // _LANE * _LANE))
    brows = min(_round_up(rows, sub),
                max(sub, (target // (tc0 * itemsize)) // sub * sub))
    r_steps = _cdiv(rows, brows)
    tc = min(tc0, max(_LANE, (target // (brows * itemsize)) // _LANE * _LANE))

    # Guarantee a few grid steps (pipelining + v7x 2-TC sharding), tile >= 512 KiB.
    if _cdiv(cols, tc) * r_steps < _MIN_GRID_STEPS:
        want_c = _cdiv(_MIN_GRID_STEPS, r_steps)
        tc_for_steps = _round_up(max(_LANE, _cdiv(cols, want_c)), _LANE)
        tc_floor = max(_LANE, (_MIN_TILE_BYTES // (brows * itemsize)) // _LANE * _LANE)
        new_tc = max(tc_floor, tc_for_steps)
        if new_tc < tc:
            tc = new_tc
    c_steps = _cdiv(cols, tc)

    if pe_is_row:
        pe_spec = pl.BlockSpec((1, tc), lambda c, r: (0, c))
    else:
        pe_spec = pl.BlockSpec((brows, tc), lambda c, r: (r, c))

    out2 = pl.pallas_call(
        _pe_add_kernel,
        out_shape=jax.ShapeDtypeStruct((rows, cols), x.dtype),
        grid=(c_steps, r_steps),       # rows innermost: pe block index constant
        in_specs=[
            pl.BlockSpec((brows, tc), lambda c, r: (r, c)),
            pe_spec,
        ],
        out_specs=pl.BlockSpec((brows, tc), lambda c, r: (r, c)),
        compiler_params=pltpu.CompilerParams(
            dimension_semantics=("parallel", "parallel")),
        cost_estimate=cost,
        input_output_aliases=io_aliases,
    )(x2, pe2)
    return out2.reshape(B, S, D)


# --------------------------------------------------------------------------
# Wrapper
# --------------------------------------------------------------------------
def positional_encoding_forward(x: jnp.ndarray, pe: jnp.ndarray, *,
                                donate_x: bool = False) -> jnp.ndarray:
    """x: (B, S, D); pe: (max_len, D).  Returns x + pe[:S, :] (broadcast over B).

    If donate_x=True, x is aliased to the output (callers must actually donate
    the buffer at the jit boundary for the alias to avoid a copy)."""
    B, S, D = x.shape
    assert pe.shape[0] >= S and pe.shape[1] == D
    pe_sliced = pe[:S, :]
    if pe_sliced.dtype != x.dtype:
        # NOTE: pe is added in the activation dtype (the PyTorch reference adds
        # an fp32 buffer -> slightly different rounding for bf16 activations).
        pe_sliced = pe_sliced.astype(x.dtype)

    itemsize = jnp.dtype(x.dtype).itemsize
    sub = _sublanes(x.dtype)
    target = _tile_target_bytes()
    io_aliases = {0: 0} if donate_x else {}
    cost = pl.CostEstimate(
        flops=B * S * D,
        transcendentals=0,
        bytes_accessed=(2 * B * S * D + S * D) * itemsize,   # x + out + pe (read once)
    )

    # Path selection:
    #  * S*D not a multiple of 128 -> (ts, D) blocks (lane-dense is impossible).
    #  * D % 128 == 0 with B < sublanes -> (ts, D) blocks (dense sublanes via S,
    #    pe read once, no reshape).
    #  * otherwise -> flat lane-dense path.
    use_seq_tiled = ((S * D) % _LANE != 0) or (D % _LANE == 0 and B < sub)
    if use_seq_tiled:
        return _forward_seq_tiled(x, pe_sliced, itemsize, sub, target, io_aliases, cost)
    return _forward_flat(x, pe_sliced, itemsize, sub, target, io_aliases, cost)


# --------------------------------------------------------------------------
# Demo / correctness check
# --------------------------------------------------------------------------
if __name__ == "__main__":
    MAX_LEN = 500
    key = jax.random.PRNGKey(0)
    ks = jax.random.split(key, 5)

    def check(B, S, D, k):
        x = jax.random.normal(k, (B, S, D), dtype=jnp.float32)
        pe = build_positional_encoding(D, max_len=MAX_LEN, dtype=jnp.float32)
        out = jax.block_until_ready(positional_encoding_forward(x, pe))
        ref = x + pe[:S, :][None, :, :]
        assert out.shape == (B, S, D)
        assert jnp.allclose(out, ref, atol=1e-6, rtol=1e-6), (B, S, D)

    check(2, 8, 32, ks[0])    # flat lane-dense path, pe row-broadcast
    check(3, 12, 40, ks[1])   # fallback (ts, D) path: S*D not a multiple of 128
    check(2, 16, 128, ks[2])  # (ts, D) lane-dense path: D % 128 == 0, small B
    check(1, 32, 32, ks[3])   # flat path with B == 1 dense-sublane fold
    check(16, 4, 32, ks[4])   # flat path with B >= 8 (no sublane padding)

    print("KERNEL_OK")
</pallas_src>

<mosaic_0001>
module attributes {stable_mosaic.version = 11 : i64} {
  func.func @_pe_add_kernel(%arg0: i32, %arg1: i32, %arg2: memref<8x256xf32, #tpu.memory_space<vmem>>, %arg3: memref<1x256xf32, #tpu.memory_space<vmem>>, %arg4: memref<8x256xf32, #tpu.memory_space<vmem>>) attributes {dimension_semantics = [#tpu.dimension_semantics<parallel>, #tpu.dimension_semantics<parallel>], iteration_bounds = array<i64: 1, 1>, scalar_prefetch = 0 : i64, scratch_operands = 0 : i64, tpu.core_type = #tpu.core_type<tc>, window_params = [{transform_indices = @transform_0, window_bounds = array<i64: 8, 256>}, {transform_indices = @transform_1, window_bounds = array<i64: 1, 256>}, {transform_indices = @transform_2, window_bounds = array<i64: 8, 256>}]} {
    %c0 = arith.constant 0 : index
    %c0_0 = arith.constant 0 : index
    %0 = vector.load %arg2[%c0, %c0_0] : memref<8x256xf32, #tpu.memory_space<vmem>>, vector<8x256xf32>
    %c0_1 = arith.constant 0 : index
    %c0_2 = arith.constant 0 : index
    %1 = vector.load %arg3[%c0_1, %c0_2] : memref<1x256xf32, #tpu.memory_space<vmem>>, vector<1x256xf32>
    %2 = vector.broadcast %1 : vector<1x256xf32> to vector<8x256xf32>
    %3 = arith.addf %0, %2 : vector<8x256xf32>
    %c0_3 = arith.constant 0 : index
    %c0_4 = arith.constant 0 : index
    %4 = vector.load %arg4[%c0_3, %c0_4] : memref<8x256xf32, #tpu.memory_space<vmem>>, vector<8x256xf32>
    tpu.vector_store %arg4[%c0_3, %c0_4], %3 {strides = array<i32>} : memref<8x256xf32, #tpu.memory_space<vmem>>, vector<8x256xf32>,
    return
  }
  func.func @transform_0(%arg0: i32, %arg1: i32) -> (i32, i32) {
    %c0_i32 = arith.constant 0 : i32
    return %arg1, %arg0 : i32, i32
  }
  func.func @transform_1(%arg0: i32, %arg1: i32) -> (i32, i32) {
    %c0_i32 = arith.constant 0 : i32
    %c0_i32_0 = arith.constant 0 : i32
    return %c0_i32, %arg0 : i32, i32
  }
  func.func @transform_2(%arg0: i32, %arg1: i32) -> (i32, i32) {
    %c0_i32 = arith.constant 0 : i32
    return %arg1, %arg0 : i32, i32
  }
}

</mosaic_0001>

<bundles_post_ra>
// kernel: tpu_custom_call.1
= control target key start
LH: loop header
LB: loop body
LE: loop exit
PB: predicated region body
PF: predicated region fallthrough
CT: control target
= control target key end

     0   :  { %7 = vsyncpa [#allocation3], 0  ;;  %s193_s0 = inlined_call_operand.hbm [shape: f32[2,256], index: 0, kind: input, shape index: {}]   ;;  %s194_s1 = inlined_call_operand.vmem [shape: f32[1,256], index: 1, kind: input, shape index: {}]   ;;  %s195_s2 = inlined_call_operand.hbm [shape: f32[2,256], index: 2, kind: output, shape index: {}]  }
   0x1   :  { %8 = vsyncpa [#allocation4], 0 }
   0x2   :  { %13 = vsyncadd [#allocation3], 192  ;;  %s140_s9 = smov [#allocation2]   ;;  %s92_s13 = scalar_lea.hbm %s193_s0, 64 }
   0x3   :  { %s14_s10 = sshll.u32 %s140_s9, 4  ;;  %p93_p0 = scmp.ne.s32.totalorder %s193_s0, %s92_s13  ;;  %s15_s10 = int_to_ptr.vmem [resolvable:$true] %s14_s10 }
   0x4   :  { %p96_p1 = scmp.lt.u32.totalorder %s92_s13, %s193_s0 }
   0x6   :  { %p98_p2 = pnand %p96_p1, %p93_p0 }
   0x8   :  { %101 = shalt.err (!%p98_p2)
}
   0x9   :  { %s102_s18 = scalar_lea.vmem %s15_s10, 64  ;;  %s106_s19 = scalar_lea.vmem %s15_s10, 256 }
   0xa   :  { %p103_p3 = scmp.ne.s32.totalorder %s15_s10, %s102_s18  ;;  %p107_p4 = scmp.lt.s32.totalorder %s15_s10, %s15_s10 }
   0xb   :  { %p108_p5 = scmp.lt.s32.totalorder %s106_s19, %s102_s18 }
   0xd   :  { %p109_p6 = por %p108_p5, %p107_p4 }
   0xf   :  { %p110_p7 = pnand %p109_p6, %p103_p3 }
  0x11   :  { %113 = shalt.err (!%p110_p7)
}
  0x12   :  { %s141_s20 = smov 64   ;;  %s142_s21 = smov 4  }
  0x13   :  { %20 = dma.hbm_to_vmem [thread:$0]  %s193_s0, 64, %s15_s10, [#allocation3], %s141_s20, %s141_s20, %s142_s21  }
  0x14   :  { %136 = dma.done.wait [#allocation3], 256  }
  0x15   :  { %137 = vsyncadd [#allocation3], 4294967040  ;;  %v32_v0 = vlaneseq  ;;  %v143_v1 = vmov 1983009808   ;;  %v30_v7 = vld [vmem:[%s194_s1] sm:$0x3] }
  0x16   :  { %v43_v2 = vunpack.c.l.s4 %v143_v1  ;;  %v26_v13 = vld [vmem:[#allocation2] sm:$0xf]  ;;  %v28_v14 = vld [vmem:[#allocation2 + $0x8] sm:$0xf]  ;;  %v27_v17 = vld [vmem:[#allocation2 + $0x4] sm:$0xf] }
  0x17   :  { %v33_v3 = vshrl.u32 %v32_v0, 7  ;;  %v29_v18 = vld [vmem:[#allocation2 + $0xc] sm:$0xf] }
  0x18   :  { %v44_v6 = vunpack.c.0.s8 %v43_v2 }
  0x19   :  { %v34_v4 = vsub.s32 0, %v33_v3  ;;  %v38_v5 = vsub.s32 1, %v33_v3 }
  0x1a   :  { %v47_v10 = vsub.s32 %v44_v6, %v33_v3 }
  0x1b   :  { %v35_v8 = vrot.slane %v30_v7, %v34_v4  ;;  %v39_v9 = vrot.slane %v30_v7, %v38_v5 }
  0x1d   :  { %v40_v11 = vcombine.low %v35_v8, %v39_v9  ;;  %v41_v12 = vcombine.high %v35_v8, %v39_v9 }
  0x1f   :  { %v48_v15 = vrot.slane %v40_v11, %v47_v10  ;;  %v55_v16 = vrot.slane %v41_v12, %v47_v10 }
  0x21   :  { %v62_v19 = vadd.f32 %v48_v15, %v26_v13  ;;  %v56_v20 = vcombine.high %v48_v15, %v48_v15  ;;  %v64_v21 = vadd.f32 %v55_v16, %v28_v14  ;;  %v57_v22 = vcombine.high %v55_v16, %v55_v16 }
  0x23   :  { %66 = vst [vmem:[#allocation5] sm:$0xf] %v62_v19  ;;  %v63_v23 = vadd.f32 %v56_v20, %v27_v17  ;;  %68 = vst [vmem:[#allocation5 + $0x8] sm:$0xf] %v64_v21  ;;  %v65_v24 = vadd.f32 %v57_v22, %v29_v18 }
  0x25   :  { %67 = vst [vmem:[#allocation5 + $0x4] sm:$0xf] %v63_v23  ;;  %69 = vst [vmem:[#allocation5 + $0xc] sm:$0xf] %v65_v24 }
  0x26   :  { %74 = vsyncadd [#allocation4], 192  ;;  %s144_s0 = smov [#allocation5]  }
  0x27   :  { %s75_s1 = sshll.u32 %s144_s0, 4  ;;  %s76_s1 = int_to_ptr.vmem [resolvable:$true] %s75_s1 }
  0x28   :  { %s114_s26 = scalar_lea.vmem %s76_s1, 64  ;;  %s118_s27 = scalar_lea.vmem %s76_s1, 256 }
  0x29   :  { %p115_p8 = scmp.ne.s32.totalorder %s76_s1, %s114_s26  ;;  %p119_p9 = scmp.lt.s32.totalorder %s76_s1, %s76_s1 }
  0x2a   :  { %p120_p10 = scmp.lt.s32.totalorder %s118_s27, %s114_s26 }
  0x2c   :  { %p121_p11 = por %p120_p10, %p119_p9 }
  0x2e   :  { %p122_p12 = pnand %p121_p11, %p115_p8 }
  0x30   :  { %125 = shalt.err (!%p122_p12)
}
  0x31   :  { %s126_s30 = scalar_lea.hbm %s195_s2, 64 }
  0x32   :  { %p127_p13 = scmp.ne.s32.totalorder %s195_s2, %s126_s30  ;;  %p130_p0 = scmp.lt.u32.totalorder %s126_s30, %s195_s2 }
  0x34   :  { %p132_p1 = pnand %p130_p0, %p127_p13 }
  0x36   :  { %135 = shalt.err (!%p132_p1)
}
  0x37   :  { %81 = dma.vmem_to_hbm [thread:$0]  %s76_s1, 64, %s195_s2, [#allocation4], %s141_s20, %s141_s20, %s142_s21  }
  0x38   :  { %138 = dma.done.wait [#allocation4], 256  }
  0x39   :  { %139 = vsyncadd [#allocation4], 4294967040 }
  0x3a   :  { %85 = vsyncpa [#allocation3], 1 }
  0x3b   :  { %86 = vsyncpa [#allocation4], 1 }

</bundles_post_ra>
